<compile_context>
chip_gen: v6e
topology: v6e:2x2x1
jax: 0.10.0
libtpu: 0.0.40
codegen_flags: <defaults>
</compile_context>

<pallas_src>
import jax
import jax.numpy as jnp
from jax.experimental import pallas as pl
from jax.experimental.pallas import tpu as pltpu


def mlp_kernel(x_ref, p_ref, y_ref):
    # x_ref: (1, B_pad)   batch on lanes
    # p_ref: (H, 4)       columns: [w1, b1, w2, b2 (broadcast down the column)]
    # y_ref: (1, B_pad)
    x = x_ref[...]                      # (1, B_pad)
    p = p_ref[...]                      # (H, 4)
    w1 = p[:, 0:1]                      # (H, 1)
    b1 = p[:, 1:2]                      # (H, 1)
    w2 = p[:, 2:3]                      # (H, 1)
    b2 = p[0:1, 3:4]                    # (1, 1)

    # hidden = relu(w1 * x + b1): pure VPU broadcast ops, shape (H, B_pad).
    h = jnp.maximum(w1 * x + b1, 0.0)
    # predict = sum_H(w2 * h) + b2: VPU multiply + XLU sublane reduce -> (1, B_pad).
    y = jnp.sum(w2 * h, axis=0, keepdims=True) + b2
    y_ref[...] = y.astype(y_ref.dtype)


def net_forward(x, w1, b1, w2, b2):
    """Pallas implementation of Net.forward: relu(Linear(x)) -> Linear.

    x : (B, 1) float32
    w1: (H, 1)  PyTorch layout (n_hidden, n_features), n_features == 1
    b1: (H,)
    w2: (1, H)  PyTorch layout (n_output, n_hidden), n_output == 1
    b2: (1,)
    returns (B, 1) float32
    """
    B = x.shape[0]
    H = w1.shape[0]
    assert w1.shape[1] == 1 and w2.shape[0] == 1, "kernel specialized to 1 -> H -> 1"
    B_pad = ((B + 127) // 128) * 128

    # Lane-dense batch layout, zero-padded to a multiple of 128 lanes.
    x_lanes = jnp.zeros((1, B_pad), jnp.float32).at[0, :B].set(x[:, 0].astype(jnp.float32))

    # Pack all parameters into one (H, 4) operand to cut DMA count to 2.
    params = jnp.stack(
        [w1[:, 0], b1, w2[0, :], jnp.full((H,), b2[0], jnp.float32)], axis=1
    ).astype(jnp.float32)

    vmem = lambda: pl.BlockSpec(memory_space=pltpu.MemorySpace.VMEM)
    y_lanes = pl.pallas_call(
        mlp_kernel,
        out_shape=jax.ShapeDtypeStruct((1, B_pad), jnp.float32),
        in_specs=[vmem(), vmem()],
        out_specs=vmem(),
    )(x_lanes, params)

    # Slice off lane padding and restore (B, 1) layout.
    return y_lanes[0, :B].reshape(B, 1)


if __name__ == "__main__":
    # Mirror the reference script: x = linspace(-1, 1, 100).unsqueeze(1) -> (100, 1)
    n_features, n_hidden, n_output = 1, 32, 1
    batch = 100

    key = jax.random.PRNGKey(0)
    k1, k2, k3, k4 = jax.random.split(key, 4)
    bound1 = 1.0 / (n_features ** 0.5)
    bound2 = 1.0 / (n_hidden ** 0.5)
    # PyTorch-layout parameters (deterministic, uniform +-1/sqrt(fan_in)).
    w1 = jax.random.uniform(k1, (n_hidden, n_features), jnp.float32, -bound1, bound1)
    b1 = jax.random.uniform(k2, (n_hidden,), jnp.float32, -bound1, bound1)
    w2 = jax.random.uniform(k3, (n_output, n_hidden), jnp.float32, -bound2, bound2)
    b2 = jax.random.uniform(k4, (n_output,), jnp.float32, -bound2, bound2)

    x = jnp.linspace(-1.0, 1.0, batch, dtype=jnp.float32).reshape(batch, 1)

    fwd = jax.jit(net_forward)
    y = fwd(x, w1, b1, w2, b2)
    jax.block_until_ready(y)

    # Pure-JAX reference (same math as the PyTorch module).
    h_ref = jnp.maximum(x @ w1.T + b1, 0.0)
    y_ref = h_ref @ w2.T + b2
    assert y.shape == (batch, n_output)
    assert jnp.allclose(y, y_ref, atol=1e-5, rtol=1e-5)

    print("KERNEL_OK")
</pallas_src>

<mosaic_0001>
module attributes {stable_mosaic.version = 11 : i64} {
  func.func @mlp_kernel(%arg0: memref<1x128xf32, #tpu.memory_space<vmem>>, %arg1: memref<32x4xf32, #tpu.memory_space<vmem>>, %arg2: memref<1x128xf32, #tpu.memory_space<vmem>>) attributes {dimension_semantics = [], scalar_prefetch = 0 : i64, scratch_operands = 0 : i64, tpu.core_type = #tpu.core_type<tc>} {
    %c0 = arith.constant 0 : index
    %c0_0 = arith.constant 0 : index
    %0 = vector.load %arg0[%c0, %c0_0] : memref<1x128xf32, #tpu.memory_space<vmem>>, vector<1x128xf32>
    %c0_1 = arith.constant 0 : index
    %c0_2 = arith.constant 0 : index
    %1 = vector.load %arg1[%c0_1, %c0_2] : memref<32x4xf32, #tpu.memory_space<vmem>>, vector<32x4xf32>
    %2 = vector.extract_strided_slice %1 {offsets = [0, 0], sizes = [32, 1], strides = [1, 1]} : vector<32x4xf32> to vector<32x1xf32>
    %3 = vector.extract_strided_slice %1 {offsets = [0, 1], sizes = [32, 1], strides = [1, 1]} : vector<32x4xf32> to vector<32x1xf32>
    %4 = vector.extract_strided_slice %1 {offsets = [0, 2], sizes = [32, 1], strides = [1, 1]} : vector<32x4xf32> to vector<32x1xf32>
    %5 = vector.extract_strided_slice %1 {offsets = [0, 3], sizes = [1, 1], strides = [1, 1]} : vector<32x4xf32> to vector<1x1xf32>
    %6 = vector.broadcast %2 : vector<32x1xf32> to vector<32x128xf32>
    %7 = vector.broadcast %0 : vector<1x128xf32> to vector<32x128xf32>
    %8 = arith.mulf %6, %7 : vector<32x128xf32>
    %9 = vector.broadcast %3 : vector<32x1xf32> to vector<32x128xf32>
    %10 = arith.addf %8, %9 : vector<32x128xf32>
    %cst = arith.constant 0.000000e+00 : f32
    %11 = vector.broadcast %cst : f32 to vector<32x128xf32>
    %12 = arith.maximumf %10, %11 : vector<32x128xf32>
    %13 = vector.broadcast %4 : vector<32x1xf32> to vector<32x128xf32>
    %14 = arith.mulf %13, %12 : vector<32x128xf32>
    %cst_3 = arith.constant dense<0.000000e+00> : vector<128xf32>
    %15 = vector.multi_reduction <add>, %14, %cst_3 [0] : vector<32x128xf32> to vector<128xf32>
    %16 = vector.shape_cast %15 : vector<128xf32> to vector<1x128xf32>
    %17 = vector.broadcast %5 : vector<1x1xf32> to vector<1x128xf32>
    %18 = arith.addf %16, %17 : vector<1x128xf32>
    %c0_4 = arith.constant 0 : index
    %c0_5 = arith.constant 0 : index
    %19 = vector.load %arg2[%c0_4, %c0_5] : memref<1x128xf32, #tpu.memory_space<vmem>>, vector<1x128xf32>
    tpu.vector_store %arg2[%c0_4, %c0_5], %18 {strides = array<i32>} : memref<1x128xf32, #tpu.memory_space<vmem>>, vector<1x128xf32>,
    return
  }
}

</mosaic_0001>

<bundles_post_ra>
// kernel: net_forward.1
= control target key start
LH: loop header
LB: loop body
LE: loop exit
PB: predicated region body
PF: predicated region fallthrough
CT: control target
= control target key end

     0   :  { %v123_v0 = vmov 0   ;;  %v124_v4 = vmov 1   ;;  %v125_v6 = vmov 2   ;;  %v126_v7 = vmov 3   ;;  %s160_s1 = inlined_call_operand.vmem [shape: f32[32,4], index: 1, kind: input, shape index: {}]   ;;  %s161_s0 = inlined_call_operand.vmem [shape: f32[1,128], index: 0, kind: input, shape index: {}]   ;;  %s162_s2 = inlined_call_operand.vmem [shape: f32[1,128], index: 2, kind: output, shape index: {}]  }
   0x1   :  { %115 = vset.pattern.permute.xlu1 %v123_v0  ;;  %114 = vset.pattern.permute.xlu0 %v123_v0  ;;  %v14_v1 = vld [vmem:[%s160_s1 + $0x10] sm:$0xff]  ;;  %v12_v2 = vld [vmem:[%s160_s1] sm:$0xff]  ;;  %v13_v3 = vld [vmem:[%s160_s1 + $0x8] sm:$0xff] }
   0x2   :  { %28 = vperm.xlu1 %115, %v14_v1   ;;  %18 = vperm.xlu0 %114, %v12_v2   ;;  %v15_v5 = vld [vmem:[%s160_s1 + $0x18] sm:$0xff]  ;;  %v109_v14 = vld [vmem:[%s161_s0] ss:$0 sm:$0xff] }
   0x6   :  { %116 = vset.pattern.permute.xlu1 %v124_v4  ;;  %23 = vperm.xlu0 %114, %v13_v3  }
   0x7   :  { %47 = vperm.xlu1 %116, %v12_v2  }
   0xa   :  { %117 = vset.pattern.permute.xlu0 %v124_v4 }
   0xb   :  { %118 = vset.pattern.permute.xlu1 %v123_v0  ;;  %51 = vperm.xlu0 %117, %v13_v3  }
   0xc   :  { %33 = vperm.xlu1 %118, %v15_v5  }
   0xf   :  { %59 = vperm.xlu0 %117, %v15_v5  }
  0x10   :  { %119 = vset.pattern.permute.xlu1 %v124_v4 }
  0x11   :  { %55 = vperm.xlu1 %119, %v14_v1  }
  0x13   :  { %121 = vset.pattern.permute.xlu0 %v125_v6 }
  0x14   :  { %75 = vperm.xlu0 %121, %v13_v3  }
  0x15   :  { %120 = vset.pattern.permute.xlu1 %v125_v6 }
  0x16   :  { %71 = vperm.xlu1 %120, %v12_v2  }
  0x18   :  { %122 = vset.pattern.permute.xlu0 %v126_v7 }
  0x19   :  { %100 = vperm.xlu0 %122, %v12_v2  }
  0x1a   :  { %79 = vperm.xlu1 %120, %v14_v1  }
  0x1e   :  { %83 = vperm.xlu1 %120, %v15_v5  }
  0x7d   :  { %v29_v8 = vpop.permute.xlu1 %28  ;;  %v19_v9 = vpop.permute.xlu0 %18 }
  0x7e   :  { %v42_v15 = vmul.f32 %v109_v14, %v19_v9  ;;  %v44_v19 = vmul.f32 %v109_v14, %v29_v8 }
  0x81   :  { %v24_v10 = vpop.permute.xlu0 %23 }
  0x82   :  { %v48_v11 = vpop.permute.xlu1 %47  ;;  %v43_v16 = vmul.f32 %v109_v14, %v24_v10 }
  0x83   :  { %v62_v20 = vadd.f32 %v48_v11, %v42_v15 }
  0x85   :  { %v66_v25 = vmax.f32 %v62_v20, 0.0 }
  0x86   :  { %v52_v12 = vpop.permute.xlu0 %51 }
  0x87   :  { %v34_v13 = vpop.permute.xlu1 %33  ;;  %v63_v21 = vadd.f32 %v52_v12, %v43_v16 }
  0x88   :  { %v45_v22 = vmul.f32 %v109_v14, %v34_v13 }
  0x89   :  { %v67_v27 = vmax.f32 %v63_v21, 0.0 }
  0x8a   :  { %v60_v18 = vpop.permute.xlu0 %59 }
  0x8b   :  { %v65_v28 = vadd.f32 %v60_v18, %v45_v22 }
  0x8c   :  { %v56_v17 = vpop.permute.xlu1 %55 }
  0x8d   :  { %v64_v23 = vadd.f32 %v56_v17, %v44_v19  ;;  %v69_v34 = vmax.f32 %v65_v28, 0.0 }
  0x8f   :  { %v76_v26 = vpop.permute.xlu0 %75  ;;  %v68_v29 = vmax.f32 %v64_v23, 0.0 }
  0x90   :  { %v87_v32 = vmul.f32 %v76_v26, %v67_v27 }
  0x91   :  { %v72_v24 = vpop.permute.xlu1 %71 }
  0x92   :  { %v86_v30 = vmul.f32 %v72_v24, %v66_v25 }
  0x94   :  { %v90_v35 = vadd.f32 %v87_v32, %v86_v30  ;;  %v101_v45 = vpop.permute.xlu0 %100 }
  0x95   :  { %v80_v31 = vpop.permute.xlu1 %79 }
  0x96   :  { %v88_v33 = vmul.f32 %v80_v31, %v68_v29 }
  0x98   :  { %v91_v37 = vadd.f32 %v90_v35, %v88_v33 }
  0x99   :  { %v84_v36 = vpop.permute.xlu1 %83 }
  0x9a   :  { %v89_v38 = vmul.f32 %v84_v36, %v69_v34 }
  0x9c   :  { %v92_v39 = vadd.f32 %v91_v37, %v89_v38 }
  0x9e   :  { %v93_v40 = vrot.slane %v92_v39, 4 }
  0xa0   :  { %v94_v41 = vadd.f32 %v93_v40, %v92_v39 }
  0xa2   :  { %v95_v42 = vrot.slane %v94_v41, 2 }
  0xa4   :  { %v96_v43 = vadd.f32 %v95_v42, %v94_v41 }
  0xa6   :  { %v97_v44 = vrot.slane %v96_v43, 1 }
  0xa8   :  { %v98_v46 = vadd.f32 %v97_v44, %v96_v43 }
  0xaa   :  { %v103_v47 = vadd.f32 %v101_v45, %v98_v46 }
  0xac   :  { %104 = vst [vmem:[%s162_s2] sm:$0x1] %v103_v47 }

</bundles_post_ra>
